<compile_context>
chip_gen: v7x
topology: tpu7x:2x2x1
jax: 0.10.0
libtpu: 0.0.40
codegen_flags: <defaults>
</compile_context>

<pallas_src>
import jax
import jax.numpy as jnp
from jax.experimental import pallas as pl
from jax.experimental.pallas import tpu as pltpu


def _round_up(n, m):
    return ((n + m - 1) // m) * m


def _double_layer_kernel(x_ref, wa_ref, wb_ref, o_ref):
    # Cast the f32 activation tile to bf16 on the VPU (hidden under DMA/MXU),
    # then one MXU matmul with f32 accumulation.                  -> (TB, H)
    h = jnp.dot(
        x_ref[...].astype(jnp.bfloat16),
        wa_ref[...],
        preferred_element_type=jnp.float32,
    )
    # Sigmoid in f32 on the EUP (f32 keeps v5e's no-bf16 VPU/EUP happy).
    s = jax.nn.sigmoid(h)
    # Second linear has output width 1: an MXU matmul would use 1/128 (v5e)
    # or 1/256 (v6e/v7x) of the result width, so do it as a VPU multiply +
    # lane (XLU) reduction against the (1, H) weight row.
    y = jnp.sum(s * wb_ref[...], axis=-1, keepdims=True)          # (TB, 1)
    # ReLU + store.  (Lane-dense (1, tb) output restructuring is a possible
    # further win but only if a bundle dump shows vst.msk / writeback stalls.)
    o_ref[...] = jnp.maximum(y, 0.0).astype(o_ref.dtype)


def prepare_weights(a_weight, b_weight):
    """One-time weight layout. Cache the result; don't redo this per call.

    a_weight: [H, D]  nn.Linear(input_dim, hidden, bias=False).weight
    b_weight: [1, H]  nn.Linear(hidden, 1, bias=False).weight
    """
    wa_bf16 = a_weight.T.astype(jnp.bfloat16)               # (D, H) MXU-native
    wb_row = b_weight.reshape(1, -1).astype(jnp.float32)    # (1, H)
    return wa_bf16, wb_row


def _pick_batch_tile(batch, input_dim, block_b):
    """Choose the batch tile: ~1 MiB of f32 x per step, 128-aligned, and
    >= 2 grid steps when the batch allows (v7x megacore + DMA overlap)."""
    b8 = _round_up(max(batch, 1), 8)
    if block_b is None:
        tgt = (1 << 20) // (4 * input_dim)          # rows per ~1 MiB f32 tile
        block_b = max(128, min(8192, (tgt // 128) * 128))
    tb = min(block_b, b8)
    if tb >= 128:
        tb = (tb // 128) * 128                      # MXU M / layout alignment
    if b8 >= 256 and pl.cdiv(b8, tb) < 2:
        # Split a single oversized tile into two so both v7x TensorCores get
        # work and the pipeline has something to overlap.
        tb = _round_up(pl.cdiv(b8, 2), 8)
        if tb >= 128:
            tb = _round_up(tb, 128)
    return tb


def double_layer_forward(x, wa_bf16, wb_row, *, block_b=None):
    """relu(sigmoid(x @ A^T) @ B^T) with pre-laid-out weights.

    x:       [B, D] f32 activations
    wa_bf16: [D, H] bf16  (= a.weight.T)   from prepare_weights
    wb_row:  [1, H] f32   (= b.weight)     from prepare_weights
    returns  [B, 1] f32
    """
    B, D = x.shape
    Dw, H = wa_bf16.shape
    assert D == Dw and wb_row.shape == (1, H)

    tb = _pick_batch_tile(B, D, block_b)
    grid = (pl.cdiv(B, tb),)   # ragged last tile is fine: OOB rows are masked

    return pl.pallas_call(
        _double_layer_kernel,
        out_shape=jax.ShapeDtypeStruct((B, 1), jnp.float32),
        grid=grid,
        in_specs=[
            # x: one (tb, D) f32 batch tile per grid step, software-pipelined
            # (double-buffered) by Pallas.
            pl.BlockSpec((tb, D), lambda i: (i, 0)),
            # Weights: whole-array VMEM residents -> copied in once, a single
            # buffer each, never re-fetched across batch tiles.
            pl.BlockSpec(memory_space=pltpu.MemorySpace.VMEM),
            pl.BlockSpec(memory_space=pltpu.MemorySpace.VMEM),
        ],
        out_specs=pl.BlockSpec((tb, 1), lambda i: (i, 0)),
        compiler_params=pltpu.CompilerParams(
            # Independent batch tiles: lets v7x's 2 TensorCores share the
            # grid; neutral on single-TC v5e/v6e.
            dimension_semantics=("parallel",),
        ),
    )(x, wa_bf16, wb_row)


if __name__ == "__main__":
    # Small shapes consistent with the module: batch=8, input_dim=32, hidden=16.
    B, D, H = 8, 32, 16

    key = jax.random.PRNGKey(0)
    kx, ka, kb = jax.random.split(key, 3)

    x = jax.random.normal(kx, (B, D), dtype=jnp.float32)
    # PyTorch nn.Linear weight layouts: a.weight [H, D], b.weight [1, H]
    # (both bias=False in the module, so there are no biases).
    a_weight = jax.random.normal(ka, (H, D), dtype=jnp.float32) * 0.1
    b_weight = jax.random.normal(kb, (1, H), dtype=jnp.float32) * 0.1

    wa_bf16, wb_row = prepare_weights(a_weight, b_weight)  # one-time layout
    out = double_layer_forward(x, wa_bf16, wb_row)
    out = jax.block_until_ready(out)
    assert out.shape == (B, 1)

    # Reference with matching bf16 matmul operands / f32 accumulate.
    h_ref = jnp.dot(
        x.astype(jnp.bfloat16),
        a_weight.T.astype(jnp.bfloat16),
        preferred_element_type=jnp.float32,
    )
    ref = jnp.maximum(jax.nn.sigmoid(h_ref) @ b_weight.T, 0.0)
    assert jnp.allclose(out, ref, atol=1e-3, rtol=1e-3), (out, ref)

    # Loose check against the pure-f32 reference (bf16 operand rounding only).
    ref_f32 = jnp.maximum(jax.nn.sigmoid(x @ a_weight.T) @ b_weight.T, 0.0)
    assert jnp.allclose(out, ref_f32, atol=2e-2, rtol=2e-2), (out, ref_f32)

    print("KERNEL_OK")
</pallas_src>

<mosaic_0001>
module attributes {stable_mosaic.version = 11 : i64} {
  func.func @_double_layer_kernel(%arg0: i32, %arg1: memref<8x32xf32, #tpu.memory_space<vmem>>, %arg2: memref<32x16xbf16, #tpu.memory_space<vmem>>, %arg3: memref<1x16xf32, #tpu.memory_space<vmem>>, %arg4: memref<8x1xf32, #tpu.memory_space<vmem>>) attributes {dimension_semantics = [#tpu.dimension_semantics<parallel>], iteration_bounds = array<i64: 1>, scalar_prefetch = 0 : i64, scratch_operands = 0 : i64, tpu.core_type = #tpu.core_type<tc>, window_params = [{transform_indices = @transform_0, window_bounds = array<i64: 8, 32>}, {pipeline_mode = #tpu.pipeline_mode<synchronous>, transform_indices = @transform_1, window_bounds = array<i64: 32, 16>}, {pipeline_mode = #tpu.pipeline_mode<synchronous>, transform_indices = @transform_2, window_bounds = array<i64: 1, 16>}, {transform_indices = @transform_3, window_bounds = array<i64: 8, 1>}]} {
    %c0 = arith.constant 0 : index
    %c0_0 = arith.constant 0 : index
    %0 = vector.load %arg1[%c0, %c0_0] : memref<8x32xf32, #tpu.memory_space<vmem>>, vector<8x32xf32>
    %1 = arith.truncf %0 : vector<8x32xf32> to vector<8x32xbf16>
    %c0_1 = arith.constant 0 : index
    %c0_2 = arith.constant 0 : index
    %2 = vector.load %arg2[%c0_1, %c0_2] : memref<32x16xbf16, #tpu.memory_space<vmem>>, vector<32x16xbf16>
    %cst = arith.constant dense<0.000000e+00> : vector<8x16xf32>
    %3 = tpu.matmul %1, %2, %cst {dimension_numbers = #tpu.dot_dimension_numbers<[1], [0], [0], [1], [0, 0, 1, 1], [], []>} : vector<8x32xbf16>, vector<32x16xbf16>, vector<8x16xf32> -> vector<8x16xf32>
    %4 = arith.negf %3 : vector<8x16xf32>
    %5 = math.exp %4 : vector<8x16xf32>
    %cst_3 = arith.constant 1.000000e+00 : f32
    %6 = vector.broadcast %cst_3 : f32 to vector<8x16xf32>
    %7 = arith.addf %6, %5 : vector<8x16xf32>
    %8 = arith.divf %6, %7 : vector<8x16xf32>
    %c0_4 = arith.constant 0 : index
    %c0_5 = arith.constant 0 : index
    %9 = vector.load %arg3[%c0_4, %c0_5] : memref<1x16xf32, #tpu.memory_space<vmem>>, vector<1x16xf32>
    %10 = vector.broadcast %9 : vector<1x16xf32> to vector<8x16xf32>
    %11 = arith.mulf %8, %10 : vector<8x16xf32>
    %cst_6 = arith.constant dense<0.000000e+00> : vector<8xf32>
    %12 = vector.multi_reduction <add>, %11, %cst_6 [1] : vector<8x16xf32> to vector<8xf32>
    %13 = vector.shape_cast %12 : vector<8xf32> to vector<8x1xf32>
    %cst_7 = arith.constant 0.000000e+00 : f32
    %14 = vector.broadcast %cst_7 : f32 to vector<8x1xf32>
    %15 = arith.maximumf %13, %14 : vector<8x1xf32>
    %c0_8 = arith.constant 0 : index
    %c0_9 = arith.constant 0 : index
    %16 = vector.load %arg4[%c0_8, %c0_9] : memref<8x1xf32, #tpu.memory_space<vmem>>, vector<8x1xf32>
    tpu.vector_store %arg4[%c0_8, %c0_9], %15 {strides = array<i32>} : memref<8x1xf32, #tpu.memory_space<vmem>>, vector<8x1xf32>,
    return
  }
  func.func @transform_0(%arg0: i32) -> (i32, i32) {
    %c0_i32 = arith.constant 0 : i32
    %c0_i32_0 = arith.constant 0 : i32
    return %arg0, %c0_i32 : i32, i32
  }
  func.func @transform_1(%arg0: i32) -> (i32, i32) {
    %c0_i32 = arith.constant 0 : i32
    %c0_i32_0 = arith.constant 0 : i32
    %c0_i32_1 = arith.constant 0 : i32
    return %c0_i32, %c0_i32_0 : i32, i32
  }
  func.func @transform_2(%arg0: i32) -> (i32, i32) {
    %c0_i32 = arith.constant 0 : i32
    %c0_i32_0 = arith.constant 0 : i32
    %c0_i32_1 = arith.constant 0 : i32
    return %c0_i32, %c0_i32_0 : i32, i32
  }
  func.func @transform_3(%arg0: i32) -> (i32, i32) {
    %c0_i32 = arith.constant 0 : i32
    %c0_i32_0 = arith.constant 0 : i32
    return %arg0, %c0_i32 : i32, i32
  }
}

</mosaic_0001>

<bundles_post_ra>
// kernel: tpu_custom_call.1
= control target key start
LH: loop header
LB: loop body
LE: loop exit
PB: predicated region body
PF: predicated region fallthrough
CT: control target
= control target key end

     0   :  { %v126_v0 = vmov 0.0   ;;  %vm127_vm0 = vmmov 0   ;;  %vm33_vm1 = vcmask 261120   ;;  %vm91_vm2 = vcmask 130048   ;;  %s163_s1 = inlined_call_operand.vmem [shape: bf16[32,16], index: 1, kind: input, shape index: {}]   ;;  %s164_s0 = inlined_call_operand.vmem [shape: f32[8,32], index: 0, kind: input, shape index: {}]   ;;  %s165_s2 = inlined_call_operand.vmem [shape: f32[1,16], index: 2, kind: input, shape index: {}]   ;;  %s166_s3 = inlined_call_operand.vmem [shape: f32[8,1], index: 3, kind: output, shape index: {}]  }
   0x1   :  { %110 = vmatprep.subr.bf16.mxu0 %v126_v0  ;;  %v120_v1 = vld [vmem:[%s163_s1] sm:$0xff]   ;;  %114 = vmatprep.mubr.msk.bf16.mxu0 %vm127_vm0, %v126_v0  ;;  %v121_v2 = vld [vmem:[%s163_s1 + $0x8] sm:$0xff]   ;;  %vm96_vm3 = vcmask 7168  }
   0x2   :  { %111 = vmatpush3.bf16.msra.mxu0 %v120_v1  ;;  %v15_v3 = vld [vmem:[%s164_s0] sm:$0xff] }
   0x3   :  { %112 = vmatprep.subr.bf16.mxu0 %v126_v0  ;;  %v16_v4 = vpack.c.bf16 %v15_v3, %v15_v3  ;;  %v106_v12 = vld [vmem:[%s165_s2] ss:$0 sm:$0xff] }
   0x6   :  { %113 = vmatpush3.bf16.msra.mxu0 %v121_v2 }
   0x9   :  { %115 = vmatmul.mubr.msk.bf16.vlgmr.msra.gmra.mrb[0].mxu0 %vm33_vm1, %v16_v4 }
  0xdc   :  { %v71_v5 = vpop.f32.mrb[0].mxu0 }
  0xdd   :  { %v105_v6 = vmul.f32 -1.442695, %v71_v5  ;;  %v116_v7 = vpop.f32.mrb[1].mxu0 }
  0xde   :  { %v74_v8 = vpop.f32.mrb[2].mxu0 }
  0xdf   :  { %122 = vpow2.f32 %v105_v6  ;;  %v117_v9 = vpop.f32.mrb[3].mxu0 }
  0xe9   :  { %v123_v10 = vpop.eup %122 }
  0xea   :  { %v80_v11 = vadd.f32 1.0, %v123_v10 }
  0xec   :  { %124 = vrcp.f32 %v80_v11 }
  0xf6   :  { %v125_v13 = vpop.eup %124 }
  0xf7   :  { %v90_v14 = vmul.f32 %v125_v13, %v106_v12 }
  0xf9   :  { %v92_v15 = vsel %vm91_vm2, %v90_v14, 0.0 }
  0xfa   :  { %93 = vadd.xlane.f32.xlu0 %v92_v15 }
 0x187   :  { %v94_v16 = vpop.xlane.xlu0 %93 }
 0x188   :  { %v95_v17 = vmax.f32 %v94_v16, 0.0 }
 0x18a   :  { %97 = vst.msk [vmem:[%s166_s3] sm:$0xff] %vm96_vm3, %v95_v17 }

</bundles_post_ra>
